<compile_context>
chip_gen: v6e
topology: v6e:2x2x1
jax: 0.10.0
libtpu: 0.0.40
codegen_flags: <defaults>
</compile_context>

<pallas_src>
import jax
import jax.numpy as jnp
from jax.experimental import pallas as pl
from jax.experimental.pallas import tpu as pltpu


# ---------------------------------------------------------------------------
# Helpers
# ---------------------------------------------------------------------------
def _round_up(n: int, m: int) -> int:
    return ((n + m - 1) // m) * m


def _pick_batch_tile(B: int, tm: int) -> int:
    """Largest batch tile <= requested (sublane-aligned); cap so the batch grid
    has >= 2 steps whenever B permits (v7x: 2 TensorCores per chip)."""
    tm = max(8, min(tm, _round_up(B, 8)))
    if pl.cdiv(B, tm) < 2 and B >= 16:
        tm = _round_up(pl.cdiv(B, 2), 8)
    return tm


def _vmem_limit_bytes(footprint_bytes: int) -> int:
    # footprint + headroom, clamped to a range that is safe on every gen
    # (v7x has 64 MiB/TC physical VMEM).
    return int(min(max(2 * footprint_bytes, 32 * 1024 * 1024), 64 * 1024 * 1024))


# ---------------------------------------------------------------------------
# Kernels
# ---------------------------------------------------------------------------
def _mlp_kernel_resident(x_ref, w1_ref, b1_ref, w2_ref, b2_ref, o_ref):
    """out = relu(x @ w1 + b1) @ w2 + b2 for one batch tile; weights resident
    in VMEM (constant index_maps)."""
    cdt = w1_ref.dtype  # MXU operand dtype (bf16 by default, f32 optional)

    # fc1 on the MXU, f32 accumulation.  x is cast in-kernel (no wrapper pass).
    h = jnp.dot(x_ref[...].astype(cdt), w1_ref[...],
                preferred_element_type=jnp.float32)
    # Bias + ReLU in f32 on the VPU (free filler under the MXU slot).
    h = jnp.maximum(h + b1_ref[...], 0.0)

    # fc2 on the MXU, f32 accumulation.  NOTE: h is rounded to the compute
    # dtype before fc2 — one extra rounding beyond "bf16 operands, f32
    # accumulate"; well within bf16-path tolerance.
    out = jnp.dot(h.astype(cdt), w2_ref[...],
                  preferred_element_type=jnp.float32)
    o_ref[...] = (out + b2_ref[...]).astype(o_ref.dtype)


def _mlp_kernel_hidden_tiled(x_ref, w1_ref, b1_ref, w2_ref, b2_ref, o_ref,
                             acc_ref):
    """Same math, with the hidden dim split across grid axis 1 (last,
    'arbitrary').  Per step: h_j = relu(x @ w1[:, j] + b1[j]);
    acc += h_j @ w2[j, :].  Output stored on the last hidden step."""
    j = pl.program_id(1)
    cdt = w1_ref.dtype

    @pl.when(j == 0)
    def _():
        acc_ref[...] = jnp.zeros_like(acc_ref)

    h = jnp.dot(x_ref[...].astype(cdt), w1_ref[...],
                preferred_element_type=jnp.float32)
    h = jnp.maximum(h + b1_ref[...], 0.0)
    acc_ref[...] += jnp.dot(h.astype(cdt), w2_ref[...],
                            preferred_element_type=jnp.float32)

    @pl.when(j == pl.num_programs(1) - 1)
    def _():
        o_ref[...] = (acc_ref[...] + b2_ref[...]).astype(o_ref.dtype)


# ---------------------------------------------------------------------------
# pallas_call wrappers
# ---------------------------------------------------------------------------
def _forward_resident(x, w1, b1, w2, b2, tm, out_dtype):
    B, input_size = x.shape
    hid = w1.shape[1]
    num_classes = w2.shape[1]
    tm = _pick_batch_tile(B, tm)
    grid_m = pl.cdiv(B, tm)

    cdt_bytes = jnp.dtype(w1.dtype).itemsize
    out_bytes = jnp.dtype(out_dtype).itemsize
    footprint = (2 * tm * input_size * x.dtype.itemsize       # x tiles (2 bufs)
                 + 2 * tm * num_classes * out_bytes           # out tiles
                 + 2 * (w1.size + w2.size) * cdt_bytes        # weights (2 bufs)
                 + 2 * (b1.size + b2.size) * 4)               # biases (f32)

    cost = pl.CostEstimate(
        flops=2 * B * input_size * hid + 2 * B * hid * num_classes,
        transcendentals=0,
        bytes_accessed=x.size * x.dtype.itemsize
        + (w1.size + w2.size) * cdt_bytes + (b1.size + b2.size) * 4
        + B * num_classes * out_bytes)

    return pl.pallas_call(
        _mlp_kernel_resident,
        out_shape=jax.ShapeDtypeStruct((B, num_classes), out_dtype),
        grid=(grid_m,),
        in_specs=[
            pl.BlockSpec((tm, input_size), lambda i: (i, 0)),    # x: batch-tiled
            pl.BlockSpec((input_size, hid), lambda i: (0, 0)),   # w1: resident
            pl.BlockSpec((1, hid), lambda i: (0, 0)),            # b1: resident
            pl.BlockSpec((hid, num_classes), lambda i: (0, 0)),  # w2: resident
            pl.BlockSpec((1, num_classes), lambda i: (0, 0)),    # b2: resident
        ],
        out_specs=pl.BlockSpec((tm, num_classes), lambda i: (i, 0)),
        compiler_params=pltpu.CompilerParams(
            dimension_semantics=("parallel",),
            vmem_limit_bytes=_vmem_limit_bytes(footprint)),
        cost_estimate=cost,
    )(x, w1, b1, w2, b2)


def _forward_hidden_tiled(x, w1, b1, w2, b2, tm, th, out_dtype):
    B, input_size = x.shape
    hid = w1.shape[1]
    num_classes = w2.shape[1]
    assert hid % th == 0, "hidden dim must be padded to a multiple of th"
    tm = _pick_batch_tile(B, tm)
    grid_m = pl.cdiv(B, tm)
    grid_h = hid // th

    cdt_bytes = jnp.dtype(w1.dtype).itemsize
    out_bytes = jnp.dtype(out_dtype).itemsize
    footprint = (2 * tm * input_size * x.dtype.itemsize
                 + 2 * tm * num_classes * out_bytes
                 + 2 * (input_size * th + th * num_classes) * cdt_bytes
                 + 2 * (th + num_classes) * 4
                 + tm * num_classes * 4)                       # acc scratch

    cost = pl.CostEstimate(
        flops=2 * B * input_size * hid + 2 * B * hid * num_classes,
        transcendentals=0,
        bytes_accessed=x.size * x.dtype.itemsize
        + grid_m * (w1.size + w2.size) * cdt_bytes + (b1.size + b2.size) * 4
        + B * num_classes * out_bytes)

    return pl.pallas_call(
        _mlp_kernel_hidden_tiled,
        out_shape=jax.ShapeDtypeStruct((B, num_classes), out_dtype),
        grid=(grid_m, grid_h),
        in_specs=[
            pl.BlockSpec((tm, input_size), lambda i, j: (i, 0)),     # x
            pl.BlockSpec((input_size, th), lambda i, j: (0, j)),     # w1 slab
            pl.BlockSpec((1, th), lambda i, j: (0, j)),              # b1 slab
            pl.BlockSpec((th, num_classes), lambda i, j: (j, 0)),    # w2 slab
            pl.BlockSpec((1, num_classes), lambda i, j: (0, 0)),     # b2
        ],
        out_specs=pl.BlockSpec((tm, num_classes), lambda i, j: (i, 0)),
        scratch_shapes=[pltpu.VMEM((tm, num_classes), jnp.float32)],
        compiler_params=pltpu.CompilerParams(
            dimension_semantics=("parallel", "arbitrary"),
            vmem_limit_bytes=_vmem_limit_bytes(footprint)),
        cost_estimate=cost,
    )(x, w1, b1, w2, b2)


# ---------------------------------------------------------------------------
# Public API: prepare weights once, return a jitted forward of x only.
# ---------------------------------------------------------------------------
def make_simple_classifier(fc1_w, fc1_b, fc2_w, fc2_b, *,
                           compute_dtype=jnp.bfloat16,  # perf default
                           tm=256,
                           hidden_block=None,
                           force_pallas=False):
    """Build a jitted SimpleClassifier forward from PyTorch-layout parameters.

    fc1_w: (hidden, input)    fc1_b: (hidden,)
    fc2_w: (classes, hidden)  fc2_b: (classes,)
    Returns fwd(x: (B, input)) -> (B, classes) in x.dtype.
    """
    hidden_size, input_size = fc1_w.shape
    num_classes = fc2_w.shape[0]

    # Auto-select the hidden-tiled path when the resident (double-buffered)
    # weight footprint would not fit comfortably in scoped VMEM (v7x: 64 MiB).
    cdt_bytes = jnp.dtype(compute_dtype).itemsize
    resident_weight_bytes = 2 * (input_size * hidden_size
                                 + hidden_size * num_classes) * cdt_bytes
    if hidden_block is None and resident_weight_bytes > 24 * 1024 * 1024:
        hidden_block = 512
    if hidden_block is not None:
        hidden_block = _round_up(hidden_block, 128)   # lane-aligned slabs
        if hidden_block >= hidden_size:
            hidden_block = None                       # one slab == resident

    # --- One-time weight prep (hoisted out of the per-call path). ---
    w1 = fc1_w.T.astype(compute_dtype)                # (in, hid), MXU dtype
    b1 = fc1_b.reshape(1, -1).astype(jnp.float32)     # (1, hid), f32 epilogue
    w2 = fc2_w.T.astype(compute_dtype)                # (hid, cls)
    b2 = fc2_b.reshape(1, -1).astype(jnp.float32)     # (1, cls)
    if hidden_block is not None:
        hid_p = _round_up(hidden_size, hidden_block)
        if hid_p != hidden_size:
            # Zero padding is exact: padded hidden units give relu(0 + 0) = 0,
            # and the matching zero rows of w2 contribute nothing.
            w1 = jnp.pad(w1, ((0, 0), (0, hid_p - hidden_size)))
            b1 = jnp.pad(b1, ((0, 0), (0, hid_p - hidden_size)))
            w2 = jnp.pad(w2, ((0, hid_p - hidden_size), (0, 0)))

    # Small-problem bypass: at micro sizes the fixed pallas_call overhead
    # dominates; XLA's fused dot is strictly faster.
    tiny = (input_size * hidden_size + hidden_size * num_classes) < 128 * 128
    use_pallas = force_pallas or not tiny

    @jax.jit
    def fwd(x):
        out_dtype = x.dtype
        if not use_pallas:
            h = jnp.maximum(
                jnp.dot(x.astype(compute_dtype), w1,
                        preferred_element_type=jnp.float32) + b1, 0.0)
            out = jnp.dot(h.astype(compute_dtype), w2,
                          preferred_element_type=jnp.float32) + b2
            return out.astype(out_dtype)
        if hidden_block is None:
            return _forward_resident(x, w1, b1, w2, b2, tm, out_dtype)
        return _forward_hidden_tiled(x, w1, b1, w2, b2, tm, hidden_block,
                                     out_dtype)

    return fwd


def _reference(x, fc1_w, fc1_b, fc2_w, fc2_b):
    h = jnp.maximum(x @ fc1_w.T + fc1_b, 0.0)
    return h @ fc2_w.T + fc2_b


# ---------------------------------------------------------------------------
# Demo / self-check
# ---------------------------------------------------------------------------
if __name__ == "__main__":
    key = jax.random.PRNGKey(0)
    k1, k2 = jax.random.split(key, 2)

    def make_inputs(k, B, input_size, hidden_size, num_classes):
        kx, kw1, kb1, kw2, kb2 = jax.random.split(k, 5)
        x = jax.random.normal(kx, (B, input_size), jnp.float32)
        fc1_w = jax.random.normal(kw1, (hidden_size, input_size), jnp.float32) * 0.1
        fc1_b = jax.random.normal(kb1, (hidden_size,), jnp.float32) * 0.1
        fc2_w = jax.random.normal(kw2, (num_classes, hidden_size), jnp.float32) * 0.1
        fc2_b = jax.random.normal(kb2, (num_classes,), jnp.float32) * 0.1
        return x, fc1_w, fc1_b, fc2_w, fc2_b

    # 1) Resident-weight kernel, bf16 MXU operands (the perf default).
    x, fw1, fb1, fw2, fb2 = make_inputs(k1, 8, 32, 64, 16)
    ref = _reference(x, fw1, fb1, fw2, fb2)

    fwd_bf16 = make_simple_classifier(fw1, fb1, fw2, fb2, force_pallas=True)
    out_bf16 = jax.block_until_ready(fwd_bf16(x))
    assert out_bf16.shape == (8, 16) and out_bf16.dtype == x.dtype
    assert jnp.allclose(out_bf16, ref, atol=5e-2, rtol=5e-2)

    # 2) Resident-weight kernel, f32 operands (tighter tolerance).  Mosaic's
    #    f32 matmul lowering is multi-pass (near-f32 accurate); pass
    #    precision=jax.lax.Precision.HIGHEST if 1e-5 must hold everywhere.
    fwd_f32 = make_simple_classifier(fw1, fb1, fw2, fb2,
                                     compute_dtype=jnp.float32,
                                     force_pallas=True)
    out_f32 = jax.block_until_ready(fwd_f32(x))
    assert out_f32.shape == (8, 16)
    assert jnp.allclose(out_f32, ref, atol=1e-3, rtol=1e-3)

    # 3) Hidden-tiled accumulator kernel (VMEM-bounded fallback for large
    #    weights), exercised at a small shape with hidden_block=128 and a
    #    partial batch tile (B=24 -> two batch-grid steps, second one masked).
    x3, gw1, gb1, gw2, gb2 = make_inputs(k2, 24, 32, 256, 16)
    ref3 = _reference(x3, gw1, gb1, gw2, gb2)
    fwd_tiled = make_simple_classifier(gw1, gb1, gw2, gb2,
                                       hidden_block=128, force_pallas=True)
    out3 = jax.block_until_ready(fwd_tiled(x3))
    assert out3.shape == (24, 16) and out3.dtype == x3.dtype
    assert jnp.allclose(out3, ref3, atol=5e-2, rtol=5e-2)

    print("KERNEL_OK")
</pallas_src>

<mosaic_0001>
module attributes {stable_mosaic.version = 11 : i64} {
  func.func @_mlp_kernel_resident(%arg0: i32, %arg1: memref<8x32xf32, #tpu.memory_space<vmem>>, %arg2: memref<32x64xbf16, #tpu.memory_space<vmem>>, %arg3: memref<1x64xf32, #tpu.memory_space<vmem>>, %arg4: memref<64x16xbf16, #tpu.memory_space<vmem>>, %arg5: memref<1x16xf32, #tpu.memory_space<vmem>>, %arg6: memref<8x16xf32, #tpu.memory_space<vmem>>) attributes {dimension_semantics = [#tpu.dimension_semantics<parallel>], iteration_bounds = array<i64: 1>, scalar_prefetch = 0 : i64, scratch_operands = 0 : i64, tpu.core_type = #tpu.core_type<tc>, window_params = [{transform_indices = @transform_0, window_bounds = array<i64: 8, 32>}, {pipeline_mode = #tpu.pipeline_mode<synchronous>, transform_indices = @transform_1, window_bounds = array<i64: 32, 64>}, {pipeline_mode = #tpu.pipeline_mode<synchronous>, transform_indices = @transform_2, window_bounds = array<i64: 1, 64>}, {pipeline_mode = #tpu.pipeline_mode<synchronous>, transform_indices = @transform_3, window_bounds = array<i64: 64, 16>}, {pipeline_mode = #tpu.pipeline_mode<synchronous>, transform_indices = @transform_4, window_bounds = array<i64: 1, 16>}, {transform_indices = @transform_5, window_bounds = array<i64: 8, 16>}]} {
    %c0 = arith.constant 0 : index
    %c0_0 = arith.constant 0 : index
    %0 = vector.load %arg1[%c0, %c0_0] : memref<8x32xf32, #tpu.memory_space<vmem>>, vector<8x32xf32>
    %1 = arith.truncf %0 : vector<8x32xf32> to vector<8x32xbf16>
    %c0_1 = arith.constant 0 : index
    %c0_2 = arith.constant 0 : index
    %2 = vector.load %arg2[%c0_1, %c0_2] : memref<32x64xbf16, #tpu.memory_space<vmem>>, vector<32x64xbf16>
    %cst = arith.constant dense<0.000000e+00> : vector<8x64xf32>
    %3 = tpu.matmul %1, %2, %cst {dimension_numbers = #tpu.dot_dimension_numbers<[1], [0], [0], [1], [0, 0, 1, 1], [], []>} : vector<8x32xbf16>, vector<32x64xbf16>, vector<8x64xf32> -> vector<8x64xf32>
    %c0_3 = arith.constant 0 : index
    %c0_4 = arith.constant 0 : index
    %4 = vector.load %arg3[%c0_3, %c0_4] : memref<1x64xf32, #tpu.memory_space<vmem>>, vector<1x64xf32>
    %5 = vector.broadcast %4 : vector<1x64xf32> to vector<8x64xf32>
    %6 = arith.addf %3, %5 : vector<8x64xf32>
    %cst_5 = arith.constant 0.000000e+00 : f32
    %7 = vector.broadcast %cst_5 : f32 to vector<8x64xf32>
    %8 = arith.maximumf %6, %7 : vector<8x64xf32>
    %9 = arith.truncf %8 : vector<8x64xf32> to vector<8x64xbf16>
    %c0_6 = arith.constant 0 : index
    %c0_7 = arith.constant 0 : index
    %10 = vector.load %arg4[%c0_6, %c0_7] : memref<64x16xbf16, #tpu.memory_space<vmem>>, vector<64x16xbf16>
    %cst_8 = arith.constant dense<0.000000e+00> : vector<8x16xf32>
    %11 = tpu.matmul %9, %10, %cst_8 {dimension_numbers = #tpu.dot_dimension_numbers<[1], [0], [0], [1], [0, 0, 1, 1], [], []>} : vector<8x64xbf16>, vector<64x16xbf16>, vector<8x16xf32> -> vector<8x16xf32>
    %c0_9 = arith.constant 0 : index
    %c0_10 = arith.constant 0 : index
    %12 = vector.load %arg5[%c0_9, %c0_10] : memref<1x16xf32, #tpu.memory_space<vmem>>, vector<1x16xf32>
    %13 = vector.broadcast %12 : vector<1x16xf32> to vector<8x16xf32>
    %14 = arith.addf %11, %13 : vector<8x16xf32>
    %c0_11 = arith.constant 0 : index
    %c0_12 = arith.constant 0 : index
    %15 = vector.load %arg6[%c0_11, %c0_12] : memref<8x16xf32, #tpu.memory_space<vmem>>, vector<8x16xf32>
    tpu.vector_store %arg6[%c0_11, %c0_12], %14 {strides = array<i32>} : memref<8x16xf32, #tpu.memory_space<vmem>>, vector<8x16xf32>,
    return
  }
  func.func @transform_0(%arg0: i32) -> (i32, i32) {
    %c0_i32 = arith.constant 0 : i32
    %c0_i32_0 = arith.constant 0 : i32
    return %arg0, %c0_i32 : i32, i32
  }
  func.func @transform_1(%arg0: i32) -> (i32, i32) {
    %c0_i32 = arith.constant 0 : i32
    %c0_i32_0 = arith.constant 0 : i32
    %c0_i32_1 = arith.constant 0 : i32
    return %c0_i32, %c0_i32_0 : i32, i32
  }
  func.func @transform_2(%arg0: i32) -> (i32, i32) {
    %c0_i32 = arith.constant 0 : i32
    %c0_i32_0 = arith.constant 0 : i32
    %c0_i32_1 = arith.constant 0 : i32
    return %c0_i32, %c0_i32_0 : i32, i32
  }
  func.func @transform_3(%arg0: i32) -> (i32, i32) {
    %c0_i32 = arith.constant 0 : i32
    %c0_i32_0 = arith.constant 0 : i32
    %c0_i32_1 = arith.constant 0 : i32
    return %c0_i32, %c0_i32_0 : i32, i32
  }
  func.func @transform_4(%arg0: i32) -> (i32, i32) {
    %c0_i32 = arith.constant 0 : i32
    %c0_i32_0 = arith.constant 0 : i32
    %c0_i32_1 = arith.constant 0 : i32
    return %c0_i32, %c0_i32_0 : i32, i32
  }
  func.func @transform_5(%arg0: i32) -> (i32, i32) {
    %c0_i32 = arith.constant 0 : i32
    %c0_i32_0 = arith.constant 0 : i32
    return %arg0, %c0_i32 : i32, i32
  }
}

</mosaic_0001>

<bundles_post_ra>
// kernel: fwd.1
= control target key start
LH: loop header
LB: loop body
LE: loop exit
PB: predicated region body
PF: predicated region fallthrough
CT: control target
= control target key end

     0   :  { %10 = vsyncpa [#allocation3], 0  ;;  %s427_s0 = inlined_call_operand.hbm [shape: f32[8,32], index: 0, kind: input, shape index: {}]   ;;  %s428_s1 = inlined_call_operand.hbm [shape: bf16[32,64], index: 1, kind: input, shape index: {}]   ;;  %s429_s2 = inlined_call_operand.vmem [shape: f32[1,64], index: 2, kind: input, shape index: {}]   ;;  %s430_s3 = inlined_call_operand.hbm [shape: bf16[64,16], index: 3, kind: input, shape index: {}]   ;;  %s431_s4 = inlined_call_operand.vmem [shape: f32[1,16], index: 4, kind: input, shape index: {}]   ;;  %s432_s5 = inlined_call_operand.hbm [shape: f32[8,16], index: 5, kind: output, shape index: {}]  }
   0x1   :  { %11 = vsyncpa [#allocation6], 0 }
   0x2   :  { %12 = vsyncpa [#allocation4], 0  ;;  %s371_s18 = smov [#allocation5]  }
   0x3   :  { %s28_s19 = sshll.u32 %s371_s18, 4  ;;  %s29_s19 = int_to_ptr.vmem [resolvable:$true] %s28_s19 }
   0x4   :  { %s293_s20 = scalar_lea.vmem %s29_s19, 256  ;;  %p298_p1 = scmp.lt.s32.totalorder %s29_s19, %s29_s19 }
   0x5   :  { %p294_p0 = scmp.ne.s32.totalorder %s29_s19, %s293_s20  ;;  %p299_p2 = scmp.lt.s32.totalorder %s293_s20, %s293_s20 }
   0x7   :  { %p300_p3 = por %p299_p2, %p298_p1 }
   0x9   :  { %p301_p4 = pnand %p300_p3, %p294_p0 }
   0xb   :  { %304 = shalt.err (!%p301_p4)
}
   0xc   :  { %s372_s21 = smov 64   ;;  %s373_s22 = smov 4  }
   0xd   :  { %34 = dma.hbm_to_vmem [thread:$0]  %s428_s1, 256, %s29_s19, [#allocation6], %s372_s21, %s372_s21, %s373_s22  }
   0xe   :  { %s374_s25 = smov [#allocation2]   ;;  %s375_s27 = smov [#allocation7]  }
   0xf   :  { %s19_s26 = sshll.u32 %s374_s25, 4  ;;  %s42_s28 = sshll.u32 %s375_s27, 4  ;;  %s20_s26 = int_to_ptr.vmem [resolvable:$true] %s19_s26  ;;  %s43_s28 = int_to_ptr.vmem [resolvable:$true] %s42_s28 }
  0x10   :  { %s313_s29 = scalar_lea.vmem %s20_s26, 128  ;;  %p318_p6 = scmp.lt.s32.totalorder %s20_s26, %s20_s26 }
  0x11   :  { %p314_p5 = scmp.ne.s32.totalorder %s20_s26, %s313_s29  ;;  %p319_p7 = scmp.lt.s32.totalorder %s313_s29, %s313_s29 }
  0x13   :  { %p320_p8 = por %p319_p7, %p318_p6 }
  0x15   :  { %p321_p9 = pnand %p320_p8, %p314_p5 }
  0x17   :  { %324 = shalt.err (!%p321_p9)
}
  0x18   :  { %22 = dma.hbm_to_vmem [thread:$0]  %s427_s0, 128, %s20_s26, [#allocation3]  }
  0x19   :  { %s333_s7 = scalar_lea.vmem %s43_s28, 512  ;;  %p338_p11 = scmp.lt.s32.totalorder %s43_s28, %s43_s28 }
  0x1a   :  { %p334_p10 = scmp.ne.s32.totalorder %s43_s28, %s333_s7  ;;  %p339_p12 = scmp.lt.s32.totalorder %s333_s7, %s333_s7 }
  0x1c   :  { %p340_p13 = por %p339_p12, %p338_p11 }
  0x1e   :  { %p341_p0 = pnand %p340_p13, %p334_p10 }
  0x20   :  { %344 = shalt.err (!%p341_p0)
}
  0x21   :  { %48 = dma.hbm_to_vmem [thread:$0]  %s430_s3, 512, %s43_s28, [#allocation6], %s372_s21, %s372_s21, %s373_s22  }
  0x22   :  { %365 = dma.done.wait [#allocation3], 128  }
  0x23   :  { %366 = vsyncadd [#allocation3], 4294967168 }
  0x24   :  { %367 = dma.done.wait [#allocation6], 768  }
  0x25   :  { %368 = vsyncadd [#allocation6], 4294966528  ;;  %v376_v0 = vmov 0.0   ;;  %vm377_vm0 = vmmov 0   ;;  %v279_v1 = vld [vmem:[#allocation5 + $0x8] sm:$0xff]   ;;  %v280_v2 = vld [vmem:[#allocation5] sm:$0xff]  }
  0x26   :  { %251 = vmatprep.subr.bf16.mxu0 %v376_v0  ;;  %255 = vmatprep.mubr.msk.bf16.mxu0 %vm377_vm0, %v376_v0  ;;  %v61_v3 = vld [vmem:[#allocation2] sm:$0xff]  ;;  %v281_v4 = vld [vmem:[#allocation7 + $0x18] sm:$0xff]   ;;  %v282_v5 = vld [vmem:[#allocation7 + $0x10] sm:$0xff]   ;;  %vm86_vm1 = vcmask 261120   ;;  %vm171_vm2 = vcmask 523264   ;;  %s378_s11 = smov [#allocation8]  }
  0x27   :  { %259 = vmatprep.subr.bf16.mxu1 %v376_v0  ;;  %267 = vmatprep.mubr.msk.bf16.mxu1 %vm377_vm0, %v376_v0  ;;  %v62_v6 = vpack.c.bf16 %v61_v3, %v61_v3  ;;  %v283_v7 = vld [vmem:[#allocation7 + $0x8] sm:$0xff]   ;;  %v284_v8 = vld [vmem:[#allocation7] sm:$0xff]   ;;  %s223_s12 = sshll.u32 %s378_s11, 4  ;;  %vm215_vm3 = vcmask 130048   ;;  %s224_s12 = int_to_ptr.vmem [resolvable:$true] %s223_s12 }
  0x28   :  { %252 = vmatpush3.bf16.msra.mxu0 %v279_v1  ;;  %260 = vmatpush3.bf16.msra.mxu1 %v281_v4  ;;  %v233_v9 = vld [vmem:[%s429_s2] ss:$0 sm:$0xff]  ;;  %s345_s2 = scalar_lea.vmem %s224_s12, 128  ;;  %p350_p2 = scmp.lt.s32.totalorder %s224_s12, %s224_s12 }
  0x29   :  { %253 = vmatprep.subr.bf16.mxu0 %v376_v0  ;;  %261 = vmatprep.subr.bf16.mxu1 %v376_v0  ;;  %v237_v17 = vld [vmem:[%s431_s4] ss:$0 sm:$0xff]  ;;  %p346_p1 = scmp.ne.s32.totalorder %s224_s12, %s345_s2  ;;  %p351_p3 = scmp.lt.s32.totalorder %s345_s2, %s345_s2 }
  0x2b   :  { %p352_p4 = por %p351_p3, %p350_p2 }
  0x2c   :  { %254 = vmatpush3.bf16.msra.mxu0 %v280_v2  ;;  %262 = vmatpush3.bf16.msra.mxu1 %v282_v5 }
  0x2d   :  { %263 = vmatprep.subr.bf16.mxu1 %v376_v0  ;;  %p353_p5 = pnand %p352_p4, %p346_p1 }
  0x2f   :  { %256 = vmatmul.mubr.msk.bf16.vlgmr.msra.gmra.mxu0 %vm86_vm1, %v62_v6 }
  0x30   :  { %264 = vmatpush3.bf16.msra.mxu1 %v283_v7 }
  0x31   :  { %265 = vmatprep.subr.bf16.mxu1 %v376_v0 }
  0x34   :  { %266 = vmatpush3.bf16.msra.mxu1 %v284_v8 }
  0xef   :  { %v124_v10 = vpop.f32.mrf.mxu0 }
  0xf0   :  { %v125_v11 = vadd.f32 %v233_v9, %v124_v10 }
  0xf1   :  { %v257_v12 = vpop.f32.mrf.mxu0 }
  0xf2   :  { %v130_v13 = vmax.f32 %v125_v11, 0.0 }
  0xf3   :  { %v127_v14 = vpop.f32.mrf.mxu0 }
  0xf4   :  { %v131_v15 = vpack.c.bf16 %v130_v13, %v130_v13 }
  0xf5   :  { %v258_v16 = vpop.f32.mrf.mxu0 }
  0xf6   :  { %268 = vmatmul.mubr.msk.bf16.vlgmr.msra.gmra.mxu1 %vm171_vm2, %v131_v15 }
 0x1b6   :  { %v209_v18 = vpop.f32.mrf.mxu1 }
 0x1b7   :  { %v210_v19 = vadd.f32 %v237_v17, %v209_v18 }
 0x1b8   :  { %v269_v20 = vpop.f32.mrf.mxu1 }
 0x1b9   :  { %216 = vst.msk [vmem:[#allocation8] sm:$0xff] %vm215_vm3, %v210_v19 }
 0x1ba   :  { %v212_v21 = vpop.f32.mrf.mxu1 }
 0x1bb   :  { %356 = shalt.err (!%p353_p5)
}
 0x1bc   :  { %226 = dma.vmem_to_hbm [thread:$0]  %s224_s12, 128, %s432_s5, [#allocation4]   ;;  %v270_v22 = vpop.f32.mrf.mxu1 }
 0x1bd   :  { %369 = dma.done.wait [#allocation4], 128  }
 0x1be   :  { %370 = vsyncadd [#allocation4], 4294967168 }
 0x1bf   :  { %230 = vsyncpa [#allocation3], 1 }
 0x1c0   :  { %231 = vsyncpa [#allocation6], 1 }
 0x1c1   :  { %232 = vsyncpa [#allocation4], 1 }

</bundles_post_ra>
